<compile_context>
chip_gen: v6e
topology: v6e:2x2x1
jax: 0.10.0
libtpu: 0.0.40
codegen_flags: <defaults>
</compile_context>

<pallas_src>
import jax
import jax.numpy as jnp
from jax.experimental import pallas as pl
from jax.experimental.pallas import tpu as pltpu


def _round_up(x, m):
    return ((x + m - 1) // m) * m


def _vmem_capacity_bytes():
    try:
        return int(pltpu.get_tpu_info().vmem_capacity_bytes)
    except Exception:
        return 64 << 20  # conservative (v7x-sized) fallback


# --------------------------------------------------------------------------
# Kernels
# --------------------------------------------------------------------------
def _mlp_kernel_fused(x_ref, w1_ref, b1_ref, w2_ref, b2_ref, w3_ref, b3_ref,
                      o_ref):
    # n_k == 1 fast path: whole fc1 contraction in one MXU pass, epilogue
    # inline.  bf16 MXU operands, f32 accumulation; bias+ReLU in f32 on VPU.
    h1 = jnp.dot(x_ref[...].astype(jnp.bfloat16), w1_ref[...],
                 preferred_element_type=jnp.float32) + b1_ref[...]
    h1 = jnp.maximum(h1, 0.0)
    h2 = jnp.dot(h1.astype(jnp.bfloat16), w2_ref[...],
                 preferred_element_type=jnp.float32) + b2_ref[...]
    h2 = jnp.maximum(h2, 0.0)
    out = jnp.dot(h2.astype(jnp.bfloat16), w3_ref[...],
                  preferred_element_type=jnp.float32) + b3_ref[...]
    o_ref[...] = out.astype(o_ref.dtype)


def _mlp_kernel_ktiled(x_ref, w1_ref, b1_ref, w2_ref, b2_ref, w3_ref, b3_ref,
                       o_ref, acc_ref):
    # General path: fc1 contraction tiled over trailing K grid axis with an
    # f32 VMEM accumulator; epilogue only on the last K step.
    k = pl.program_id(1)

    @pl.when(k == 0)
    def _():
        acc_ref[...] = jnp.zeros_like(acc_ref)

    acc_ref[...] += jnp.dot(x_ref[...].astype(jnp.bfloat16), w1_ref[...],
                            preferred_element_type=jnp.float32)

    @pl.when(k == pl.num_programs(1) - 1)
    def _():
        h1 = jnp.maximum(acc_ref[...] + b1_ref[...], 0.0)
        h2 = jnp.dot(h1.astype(jnp.bfloat16), w2_ref[...],
                     preferred_element_type=jnp.float32) + b2_ref[...]
        h2 = jnp.maximum(h2, 0.0)
        out = jnp.dot(h2.astype(jnp.bfloat16), w3_ref[...],
                      preferred_element_type=jnp.float32) + b3_ref[...]
        o_ref[...] = out.astype(o_ref.dtype)


# --------------------------------------------------------------------------
# Wrapper
# --------------------------------------------------------------------------
def prepare_params(params):
    """Pad + cast weights/biases ONCE (hoisted out of the per-forward path).

    params: w1 (in,h1), b1, w2 (h1,h2), b2, w3 (h2,out), b3 -- weights stored
    as PyTorch weight.T so the kernel computes y = x @ W + b.
    """
    w1, w2, w3 = params["w1"], params["w2"], params["w3"]
    b1, b2, b3 = params["b1"], params["b2"], params["b3"]
    in_dim, hid1 = w1.shape
    hid2, out_dim = w3.shape

    k_pad = _round_up(in_dim, 128)
    h1_pad = _round_up(hid1, 128)
    h2_pad = _round_up(hid2, 128)
    out_pad = _round_up(out_dim, 128)  # lane-dense output stores

    def pad2(a, rows, cols):
        a = a.reshape(a.shape[0] if a.ndim == 2 else 1, -1)
        return jnp.pad(a, ((0, rows - a.shape[0]), (0, cols - a.shape[1])))

    return {
        "_prepared": True,
        "dims": (int(in_dim), int(hid1), int(hid2), int(out_dim)),
        "w1": pad2(w1, k_pad, h1_pad).astype(jnp.bfloat16),
        "w2": pad2(w2, h1_pad, h2_pad).astype(jnp.bfloat16),
        "w3": pad2(w3, h2_pad, out_pad).astype(jnp.bfloat16),
        "b1": pad2(b1, 1, h1_pad).astype(jnp.float32),
        "b2": pad2(b2, 1, h2_pad).astype(jnp.float32),
        "b3": pad2(b3, 1, out_pad).astype(jnp.float32),
    }


def feedforward_sentiment(x, params, *, tb=None, tk=None):
    """Forward pass of FeedForwardSentiment.

    x: (B, max_len, vocab_size) float32
    params: raw dict (see init_params) or output of prepare_params().
    returns logits (B, output_dim) float32
    """
    if not params.get("_prepared", False):
        params = prepare_params(params)

    in_dim, hid1, hid2, out_dim = params["dims"]
    w1p, b1p = params["w1"], params["b1"]
    w2p, b2p = params["w2"], params["b2"]
    w3p, b3p = params["w3"], params["b3"]
    k_pad, h1_pad = w1p.shape
    h2_pad, out_pad = w3p.shape

    B = x.shape[0]
    x_flat = x.reshape(B, -1).astype(jnp.float32)  # nn.Flatten()
    assert x_flat.shape[1] == in_dim, "flattened input does not match fc1"

    # ---- batch tile -----------------------------------------------------
    if tb is None:
        b8 = _round_up(max(B, 1), 8)
        if b8 >= 256:
            tb = 256                     # big batch: maximize W1 reuse / MXU M
        elif b8 >= 16 and (b8 // 2) % 8 == 0:
            tb = b8 // 2                 # small batch: give v7x's 2nd core a tile
        else:
            tb = b8
    tb = max(8, _round_up(tb, 8))
    b_pad = _round_up(max(B, 1), tb)
    n_b = b_pad // tb

    # ---- fc1 contraction tile, sized from a generation-aware VMEM budget --
    vmem_cap = _vmem_capacity_bytes()
    budget = min(vmem_cap, 64 << 20) // 2           # conservative working set
    fixed_bytes = (
        2 * (h1_pad * h2_pad + h2_pad * out_pad) * 2  # w2 / w3 (bf16, 2 bufs)
        + 2 * (h1_pad + h2_pad + out_pad) * 4         # biases (f32)
        + 2 * tb * out_pad * 4                        # output tiles (f32)
        + tb * h1_pad * 4                             # accumulator / h1
    )
    per_k = 2 * tb * 4 + 2 * h1_pad * 2               # x(f32)+w1(bf16), 2 bufs
    tk_budget = max(128, ((budget - fixed_bytes) // per_k) // 128 * 128)

    if tk is None:
        if k_pad <= tk_budget:
            tk = k_pad                                 # single K block -> fused
        else:
            # largest 128-multiple divisor of k_pad within the budget (cap 2048)
            q = k_pad // 128
            cap = max(1, min(tk_budget, 2048) // 128)
            d = 1
            for cand in range(min(q, cap), 0, -1):
                if q % cand == 0:
                    d = cand
                    break
            tk = 128 * d
    assert k_pad % tk == 0
    n_k = k_pad // tk

    # ---- pad activations (kernel casts f32 -> bf16 in-VMEM) --------------
    if (b_pad, k_pad) != x_flat.shape:
        x_flat = jnp.pad(x_flat, ((0, b_pad - B), (0, k_pad - in_dim)))

    # ---- VMEM limit: from actual resident blocks, clamped below physical --
    vmem_bytes = fixed_bytes + per_k * tk
    vmem_limit = int(vmem_bytes * 1.5) + (8 << 20)
    vmem_limit = max(vmem_limit, 32 << 20)
    vmem_limit = min(vmem_limit, vmem_cap - (8 << 20), 100 << 20)

    flops = 2 * b_pad * (k_pad * h1_pad + h1_pad * h2_pad + h2_pad * out_pad)
    bytes_accessed = (b_pad * k_pad * 4
                      + max(n_b, 1) * k_pad * h1_pad * 2
                      + (h1_pad * h2_pad + h2_pad * out_pad) * 2
                      + (h1_pad + h2_pad + out_pad) * 4
                      + b_pad * out_pad * 4)
    cost = pl.CostEstimate(flops=flops, transcendentals=0,
                           bytes_accessed=bytes_accessed)

    if n_k == 1:
        # Fused fast path: W1 has a constant index_map -> stays VMEM-resident
        # across all batch tiles (no re-DMA); no accumulator / predication.
        grid_spec = pltpu.PrefetchScalarGridSpec(
            num_scalar_prefetch=0,
            grid=(n_b,),
            in_specs=[
                pl.BlockSpec((tb, k_pad), lambda i: (i, 0)),          # x (f32)
                pl.BlockSpec((k_pad, h1_pad), lambda i: (0, 0)),      # w1
                pl.BlockSpec((1, h1_pad), lambda i: (0, 0)),          # b1
                pl.BlockSpec((h1_pad, h2_pad), lambda i: (0, 0)),     # w2
                pl.BlockSpec((1, h2_pad), lambda i: (0, 0)),          # b2
                pl.BlockSpec((h2_pad, out_pad), lambda i: (0, 0)),    # w3
                pl.BlockSpec((1, out_pad), lambda i: (0, 0)),         # b3
            ],
            out_specs=pl.BlockSpec((tb, out_pad), lambda i: (i, 0)),
            scratch_shapes=[],
        )
        kernel = _mlp_kernel_fused
        dim_sem = ("parallel",)
    else:
        grid_spec = pltpu.PrefetchScalarGridSpec(
            num_scalar_prefetch=0,
            grid=(n_b, n_k),
            in_specs=[
                pl.BlockSpec((tb, tk), lambda i, k: (i, k)),          # x (f32)
                pl.BlockSpec((tk, h1_pad), lambda i, k: (k, 0)),      # w1
                pl.BlockSpec((1, h1_pad), lambda i, k: (0, 0)),       # b1
                pl.BlockSpec((h1_pad, h2_pad), lambda i, k: (0, 0)),  # w2
                pl.BlockSpec((1, h2_pad), lambda i, k: (0, 0)),       # b2
                pl.BlockSpec((h2_pad, out_pad), lambda i, k: (0, 0)), # w3
                pl.BlockSpec((1, out_pad), lambda i, k: (0, 0)),      # b3
            ],
            out_specs=pl.BlockSpec((tb, out_pad), lambda i, k: (i, 0)),
            scratch_shapes=[pltpu.VMEM((tb, h1_pad), jnp.float32)],
        )
        kernel = _mlp_kernel_ktiled
        dim_sem = ("parallel", "arbitrary")

    out_padded = pl.pallas_call(
        kernel,
        out_shape=jax.ShapeDtypeStruct((b_pad, out_pad), jnp.float32),
        grid_spec=grid_spec,
        compiler_params=pltpu.CompilerParams(
            dimension_semantics=dim_sem,
            vmem_limit_bytes=int(vmem_limit),
        ),
        cost_estimate=cost,
    )(x_flat, w1p, b1p, w2p, b2p, w3p, b3p)

    # Slice off batch / output-lane padding.
    return out_padded[:B, :out_dim]


def init_params(key, input_dim, hidden1=256, hidden2=128, output_dim=3):
    """Deterministic init mimicking torch.nn.Linear default U(-1/sqrt(fan_in), +)."""
    ks = jax.random.split(key, 6)

    def linear(kw, kb, fan_in, fan_out):
        bound = 1.0 / jnp.sqrt(jnp.float32(fan_in))
        # stored as (in, out) == PyTorch weight.T
        w = jax.random.uniform(kw, (fan_in, fan_out), jnp.float32, -bound, bound)
        b = jax.random.uniform(kb, (1, fan_out), jnp.float32, -bound, bound)
        return w, b

    w1, b1 = linear(ks[0], ks[1], input_dim, hidden1)
    w2, b2 = linear(ks[2], ks[3], hidden1, hidden2)
    w3, b3 = linear(ks[4], ks[5], hidden2, output_dim)
    return {"w1": w1, "b1": b1, "w2": w2, "b2": b2, "w3": w3, "b3": b3}


if __name__ == "__main__":
    key = jax.random.PRNGKey(0)
    k_x, k_p = jax.random.split(key)

    # Small synthetic shapes consistent with the module:
    # max_len=8 tokens, vocab_size=32  ->  input_dim = 8*32 = 256
    batch, max_len, vocab_size = 2, 8, 32
    input_dim = max_len * vocab_size
    hidden1, hidden2, output_dim = 256, 128, 3   # module defaults

    x = jax.random.uniform(k_x, (batch, max_len, vocab_size), jnp.float32)
    params = init_params(k_p, input_dim, hidden1, hidden2, output_dim)
    prepared = prepare_params(params)            # pad/cast weights ONCE

    # Reference in plain JAX (f32). Kernel uses bf16 MXU operands with f32
    # accumulation, so compare with a loosened tolerance.
    xf = x.reshape(batch, -1)
    h1 = jnp.maximum(xf @ params["w1"] + params["b1"], 0.0)
    h2 = jnp.maximum(h1 @ params["w2"] + params["b2"], 0.0)
    ref = h2 @ params["w3"] + params["b3"]

    # Fused fast path (n_k == 1) -- the default for these shapes.
    logits = feedforward_sentiment(x, prepared)
    logits = jax.block_until_ready(logits)
    assert logits.shape == (batch, output_dim)
    assert jnp.allclose(logits, ref, atol=3e-2, rtol=3e-2), (
        f"fused path max abs err {jnp.max(jnp.abs(logits - ref))}")

    # Also exercise the K-tiled accumulator path (forced tk=128 -> n_k=2).
    logits_kt = feedforward_sentiment(x, prepared, tb=8, tk=128)
    logits_kt = jax.block_until_ready(logits_kt)
    assert jnp.allclose(logits_kt, ref, atol=3e-2, rtol=3e-2), (
        f"k-tiled path max abs err {jnp.max(jnp.abs(logits_kt - ref))}")

    print("KERNEL_OK")
</pallas_src>

<mosaic_0001>
module attributes {stable_mosaic.version = 11 : i64} {
  func.func @_mlp_kernel_fused(%arg0: i32, %arg1: memref<8x256xf32, #tpu.memory_space<vmem>>, %arg2: memref<256x256xbf16, #tpu.memory_space<vmem>>, %arg3: memref<1x256xf32, #tpu.memory_space<vmem>>, %arg4: memref<256x128xbf16, #tpu.memory_space<vmem>>, %arg5: memref<1x128xf32, #tpu.memory_space<vmem>>, %arg6: memref<128x128xbf16, #tpu.memory_space<vmem>>, %arg7: memref<1x128xf32, #tpu.memory_space<vmem>>, %arg8: memref<8x128xf32, #tpu.memory_space<vmem>>) attributes {dimension_semantics = [#tpu.dimension_semantics<parallel>], iteration_bounds = array<i64: 1>, scalar_prefetch = 0 : i64, scratch_operands = 0 : i64, tpu.core_type = #tpu.core_type<tc>, window_params = [{transform_indices = @transform_0, window_bounds = array<i64: 8, 256>}, {pipeline_mode = #tpu.pipeline_mode<synchronous>, transform_indices = @transform_1, window_bounds = array<i64: 256, 256>}, {pipeline_mode = #tpu.pipeline_mode<synchronous>, transform_indices = @transform_2, window_bounds = array<i64: 1, 256>}, {pipeline_mode = #tpu.pipeline_mode<synchronous>, transform_indices = @transform_3, window_bounds = array<i64: 256, 128>}, {pipeline_mode = #tpu.pipeline_mode<synchronous>, transform_indices = @transform_4, window_bounds = array<i64: 1, 128>}, {pipeline_mode = #tpu.pipeline_mode<synchronous>, transform_indices = @transform_5, window_bounds = array<i64: 128, 128>}, {pipeline_mode = #tpu.pipeline_mode<synchronous>, transform_indices = @transform_6, window_bounds = array<i64: 1, 128>}, {transform_indices = @transform_7, window_bounds = array<i64: 8, 128>}]} {
    %c0 = arith.constant 0 : index
    %c0_0 = arith.constant 0 : index
    %0 = vector.load %arg1[%c0, %c0_0] : memref<8x256xf32, #tpu.memory_space<vmem>>, vector<8x256xf32>
    %1 = arith.truncf %0 : vector<8x256xf32> to vector<8x256xbf16>
    %c0_1 = arith.constant 0 : index
    %c0_2 = arith.constant 0 : index
    %2 = vector.load %arg2[%c0_1, %c0_2] : memref<256x256xbf16, #tpu.memory_space<vmem>>, vector<256x256xbf16>
    %cst = arith.constant dense<0.000000e+00> : vector<8x256xf32>
    %3 = tpu.matmul %1, %2, %cst {dimension_numbers = #tpu.dot_dimension_numbers<[1], [0], [0], [1], [0, 0, 1, 1], [], []>} : vector<8x256xbf16>, vector<256x256xbf16>, vector<8x256xf32> -> vector<8x256xf32>
    %c0_3 = arith.constant 0 : index
    %c0_4 = arith.constant 0 : index
    %4 = vector.load %arg3[%c0_3, %c0_4] : memref<1x256xf32, #tpu.memory_space<vmem>>, vector<1x256xf32>
    %5 = vector.broadcast %4 : vector<1x256xf32> to vector<8x256xf32>
    %6 = arith.addf %3, %5 : vector<8x256xf32>
    %cst_5 = arith.constant 0.000000e+00 : f32
    %7 = vector.broadcast %cst_5 : f32 to vector<8x256xf32>
    %8 = arith.maximumf %6, %7 : vector<8x256xf32>
    %9 = arith.truncf %8 : vector<8x256xf32> to vector<8x256xbf16>
    %c0_6 = arith.constant 0 : index
    %c0_7 = arith.constant 0 : index
    %10 = vector.load %arg4[%c0_6, %c0_7] : memref<256x128xbf16, #tpu.memory_space<vmem>>, vector<256x128xbf16>
    %cst_8 = arith.constant dense<0.000000e+00> : vector<8x128xf32>
    %11 = tpu.matmul %9, %10, %cst_8 {dimension_numbers = #tpu.dot_dimension_numbers<[1], [0], [0], [1], [0, 0, 1, 1], [], []>} : vector<8x256xbf16>, vector<256x128xbf16>, vector<8x128xf32> -> vector<8x128xf32>
    %c0_9 = arith.constant 0 : index
    %c0_10 = arith.constant 0 : index
    %12 = vector.load %arg5[%c0_9, %c0_10] : memref<1x128xf32, #tpu.memory_space<vmem>>, vector<1x128xf32>
    %13 = vector.broadcast %12 : vector<1x128xf32> to vector<8x128xf32>
    %14 = arith.addf %11, %13 : vector<8x128xf32>
    %cst_11 = arith.constant 0.000000e+00 : f32
    %15 = vector.broadcast %cst_11 : f32 to vector<8x128xf32>
    %16 = arith.maximumf %14, %15 : vector<8x128xf32>
    %17 = arith.truncf %16 : vector<8x128xf32> to vector<8x128xbf16>
    %c0_12 = arith.constant 0 : index
    %c0_13 = arith.constant 0 : index
    %18 = vector.load %arg6[%c0_12, %c0_13] : memref<128x128xbf16, #tpu.memory_space<vmem>>, vector<128x128xbf16>
    %cst_14 = arith.constant dense<0.000000e+00> : vector<8x128xf32>
    %19 = tpu.matmul %17, %18, %cst_14 {dimension_numbers = #tpu.dot_dimension_numbers<[1], [0], [0], [1], [0, 0, 1, 1], [], []>} : vector<8x128xbf16>, vector<128x128xbf16>, vector<8x128xf32> -> vector<8x128xf32>
    %c0_15 = arith.constant 0 : index
    %c0_16 = arith.constant 0 : index
    %20 = vector.load %arg7[%c0_15, %c0_16] : memref<1x128xf32, #tpu.memory_space<vmem>>, vector<1x128xf32>
    %21 = vector.broadcast %20 : vector<1x128xf32> to vector<8x128xf32>
    %22 = arith.addf %19, %21 : vector<8x128xf32>
    %c0_17 = arith.constant 0 : index
    %c0_18 = arith.constant 0 : index
    %23 = vector.load %arg8[%c0_17, %c0_18] : memref<8x128xf32, #tpu.memory_space<vmem>>, vector<8x128xf32>
    tpu.vector_store %arg8[%c0_17, %c0_18], %22 {strides = array<i32>} : memref<8x128xf32, #tpu.memory_space<vmem>>, vector<8x128xf32>,
    return
  }
  func.func @transform_0(%arg0: i32) -> (i32, i32) {
    %c0_i32 = arith.constant 0 : i32
    %c0_i32_0 = arith.constant 0 : i32
    return %arg0, %c0_i32 : i32, i32
  }
  func.func @transform_1(%arg0: i32) -> (i32, i32) {
    %c0_i32 = arith.constant 0 : i32
    %c0_i32_0 = arith.constant 0 : i32
    %c0_i32_1 = arith.constant 0 : i32
    return %c0_i32, %c0_i32_0 : i32, i32
  }
  func.func @transform_2(%arg0: i32) -> (i32, i32) {
    %c0_i32 = arith.constant 0 : i32
    %c0_i32_0 = arith.constant 0 : i32
    %c0_i32_1 = arith.constant 0 : i32
    return %c0_i32, %c0_i32_0 : i32, i32
  }
  func.func @transform_3(%arg0: i32) -> (i32, i32) {
    %c0_i32 = arith.constant 0 : i32
    %c0_i32_0 = arith.constant 0 : i32
    %c0_i32_1 = arith.constant 0 : i32
    return %c0_i32, %c0_i32_0 : i32, i32
  }
  func.func @transform_4(%arg0: i32) -> (i32, i32) {
    %c0_i32 = arith.constant 0 : i32
    %c0_i32_0 = arith.constant 0 : i32
    %c0_i32_1 = arith.constant 0 : i32
    return %c0_i32, %c0_i32_0 : i32, i32
  }
  func.func @transform_5(%arg0: i32) -> (i32, i32) {
    %c0_i32 = arith.constant 0 : i32
    %c0_i32_0 = arith.constant 0 : i32
    %c0_i32_1 = arith.constant 0 : i32
    return %c0_i32, %c0_i32_0 : i32, i32
  }
  func.func @transform_6(%arg0: i32) -> (i32, i32) {
    %c0_i32 = arith.constant 0 : i32
    %c0_i32_0 = arith.constant 0 : i32
    %c0_i32_1 = arith.constant 0 : i32
    return %c0_i32, %c0_i32_0 : i32, i32
  }
  func.func @transform_7(%arg0: i32) -> (i32, i32) {
    %c0_i32 = arith.constant 0 : i32
    %c0_i32_0 = arith.constant 0 : i32
    return %arg0, %c0_i32 : i32, i32
  }
}

</mosaic_0001>

<bundles_post_ra>
// kernel: tpu_custom_call.1
= control target key start
LH: loop header
LB: loop body
LE: loop exit
PB: predicated region body
PF: predicated region fallthrough
CT: control target
= control target key end

     0   :  { %12 = vsyncpa [#allocation3], 0  ;;  %s1015_s0 = inlined_call_operand.hbm [shape: f32[8,256], index: 0, kind: input, shape index: {}]   ;;  %s1016_s1 = inlined_call_operand.hbm [shape: bf16[256,256], index: 1, kind: input, shape index: {}]   ;;  %s1017_s2 = inlined_call_operand.vmem [shape: f32[1,256], index: 2, kind: input, shape index: {}]   ;;  %s1018_s3 = inlined_call_operand.hbm [shape: bf16[256,128], index: 3, kind: input, shape index: {}]   ;;  %s1019_s4 = inlined_call_operand.vmem [shape: f32[1,128], index: 4, kind: input, shape index: {}]   ;;  %s1020_s5 = inlined_call_operand.hbm [shape: bf16[128,128], index: 5, kind: input, shape index: {}]   ;;  %s1021_s6 = inlined_call_operand.vmem [shape: f32[1,128], index: 6, kind: input, shape index: {}]   ;;  %s1022_s7 = inlined_call_operand.hbm [shape: f32[8,128], index: 7, kind: output, shape index: {}]  }
   0x1   :  { %13 = vsyncpa [#allocation6], 0 }
   0x2   :  { %14 = vsyncpa [#allocation9], 0 }
   0x3   :  { %15 = vsyncpa [#allocation4], 0  ;;  %s940_s24 = smov [#allocation5]  }
   0x4   :  { %s31_s25 = sshll.u32 %s940_s24, 4  ;;  %s32_s25 = int_to_ptr.vmem [resolvable:$true] %s31_s25 }
   0x5   :  { %s840_s26 = scalar_lea.vmem %s32_s25, 4096  ;;  %p845_p1 = scmp.lt.s32.totalorder %s32_s25, %s32_s25 }
   0x6   :  { %p841_p0 = scmp.ne.s32.totalorder %s32_s25, %s840_s26  ;;  %p846_p2 = scmp.lt.s32.totalorder %s840_s26, %s840_s26 }
   0x8   :  { %p847_p3 = por %p846_p2, %p845_p1 }
   0xa   :  { %p848_p4 = pnand %p847_p3, %p841_p0 }
   0xc   :  { %851 = shalt.err (!%p848_p4)
}
   0xd   :  { %s941_s27 = smov 128   ;;  %s942_s28 = smov 8  }
   0xe   :  { %37 = dma.hbm_to_vmem [thread:$0]  %s1016_s1, 4096, %s32_s25, [#allocation6], %s941_s27, %s941_s27, %s942_s28  }
   0xf   :  { %s943_s8 = smov [#allocation2]   ;;  %s944_s10 = smov [#allocation7]  }
  0x10   :  { %s22_s9 = sshll.u32 %s943_s8, 4  ;;  %s45_s11 = sshll.u32 %s944_s10, 4  ;;  %s23_s9 = int_to_ptr.vmem [resolvable:$true] %s22_s9  ;;  %s46_s11 = int_to_ptr.vmem [resolvable:$true] %s45_s11 }
  0x11   :  { %s860_s12 = scalar_lea.vmem %s23_s9, 256  ;;  %p865_p6 = scmp.lt.s32.totalorder %s23_s9, %s23_s9 }
  0x12   :  { %p861_p5 = scmp.ne.s32.totalorder %s23_s9, %s860_s12  ;;  %p866_p7 = scmp.lt.s32.totalorder %s860_s12, %s860_s12 }
  0x14   :  { %p867_p8 = por %p866_p7, %p865_p6 }
  0x16   :  { %p868_p9 = pnand %p867_p8, %p861_p5 }
  0x18   :  { %871 = shalt.err (!%p868_p9)
}
  0x19   :  { %25 = dma.hbm_to_vmem [thread:$0]  %s1015_s0, 256, %s23_s9, [#allocation3]  }
  0x1a   :  { %s880_s15 = scalar_lea.vmem %s46_s11, 2048  ;;  %p885_p11 = scmp.lt.s32.totalorder %s46_s11, %s46_s11 }
  0x1b   :  { %p881_p10 = scmp.ne.s32.totalorder %s46_s11, %s880_s15  ;;  %p886_p12 = scmp.lt.s32.totalorder %s880_s15, %s880_s15 }
  0x1d   :  { %p887_p13 = por %p886_p12, %p885_p11 }
  0x1f   :  { %p888_p0 = pnand %p887_p13, %p881_p10 }
  0x21   :  { %891 = shalt.err (!%p888_p0)
}
  0x22   :  { %s945_s1 = smov 64   ;;  %s946_s16 = smov 4  }
  0x23   :  { %51 = dma.hbm_to_vmem [thread:$0]  %s1018_s3, 2048, %s46_s11, [#allocation6], %s945_s1, %s945_s1, %s946_s16  }
  0x24   :  { %s947_s19 = smov [#allocation8]  }
  0x25   :  { %s59_s20 = sshll.u32 %s947_s19, 4  ;;  %s60_s20 = int_to_ptr.vmem [resolvable:$true] %s59_s20 }
  0x26   :  { %s900_s21 = scalar_lea.vmem %s60_s20, 1024  ;;  %p905_p2 = scmp.lt.s32.totalorder %s60_s20, %s60_s20 }
  0x27   :  { %p901_p1 = scmp.ne.s32.totalorder %s60_s20, %s900_s21  ;;  %p906_p3 = scmp.lt.s32.totalorder %s900_s21, %s900_s21 }
  0x29   :  { %p907_p4 = por %p906_p3, %p905_p2 }
  0x2b   :  { %p908_p5 = pnand %p907_p4, %p901_p1 }
  0x2d   :  { %911 = shalt.err (!%p908_p5)
}
  0x2e   :  { %65 = dma.hbm_to_vmem [thread:$0]  %s1020_s5, 1024, %s60_s20, [#allocation9], %s945_s1, %s945_s1, %s946_s16  }
  0x2f   :  { %932 = dma.done.wait [#allocation3], 256  }
  0x30   :  { %933 = vsyncadd [#allocation3], 4294967040 }
  0x31   :  { %934 = dma.done.wait [#allocation6], 6144  }
  0x32   :  { %935 = vsyncadd [#allocation6], 4294961152 }
  0x33   :  { %936 = dma.done.wait [#allocation9], 1024  }
  0x34   :  { %937 = vsyncadd [#allocation9], 4294966272  ;;  %v760_v0 = vld [vmem:[#allocation5 + $0x74] ss:$8 sps:$4 sm:$0xff]   ;;  %v762_v1 = vld [vmem:[#allocation5 + $0x70] ss:$8 sps:$4 sm:$0xff]   ;;  %v119_v53 = vlaneseq }
  0x35   :  { %289 = vmatprep.subr.bf16.mxu0 %v760_v0  ;;  %v763_v2 = vld [vmem:[#allocation5 + $0x64] ss:$8 sps:$4 sm:$0xff]   ;;  %v765_v3 = vld [vmem:[#allocation5 + $0x60] ss:$8 sps:$4 sm:$0xff]   ;;  %v766_v4 = vld [vmem:[#allocation5 + $0x54] ss:$8 sps:$4 sm:$0xff]  }
  0x36   :  { %290 = vmatpush1.bf16.msra.mxu0 %v762_v1  ;;  %v768_v5 = vld [vmem:[#allocation5 + $0x50] ss:$8 sps:$4 sm:$0xff]   ;;  %v769_v6 = vld [vmem:[#allocation5 + $0x44] ss:$8 sps:$4 sm:$0xff]   ;;  %v771_v7 = vld [vmem:[#allocation5 + $0x40] ss:$8 sps:$4 sm:$0xff]  }
  0x37   :  { %291 = vmatprep.subr.bf16.mxu0 %v763_v2  ;;  %v772_v8 = vld [vmem:[#allocation5 + $0x34] ss:$8 sps:$4 sm:$0xff]   ;;  %v774_v9 = vld [vmem:[#allocation5 + $0x30] ss:$8 sps:$4 sm:$0xff]   ;;  %v775_v10 = vld [vmem:[#allocation5 + $0x24] ss:$8 sps:$4 sm:$0xff]  }
  0x38   :  { %v777_v11 = vld [vmem:[#allocation5 + $0x20] ss:$8 sps:$4 sm:$0xff]   ;;  %v778_v12 = vld [vmem:[#allocation5 + $0x14] ss:$8 sps:$4 sm:$0xff]   ;;  %v780_v13 = vld [vmem:[#allocation5 + $0x10] ss:$8 sps:$4 sm:$0xff]  }
  0x39   :  { %v82_v14 = vld [vmem:[#allocation2 + $0x8] sm:$0xff]  ;;  %v781_v15 = vld [vmem:[#allocation5 + $0x4] ss:$8 sps:$4 sm:$0xff]   ;;  %v810_v19 = vld [vmem:[#allocation7 + $0x70] sm:$0xff]   ;;  %v948_v52 = vmov 0.0   ;;  %v120_v54 = vshrl.u32 %v119_v53, 7 }
  0x3a   :  { %292 = vmatpush1.bf16.msra.mxu0 %v765_v3  ;;  %v84_v16 = vpack.c.bf16 %v82_v14, %v82_v14  ;;  %v808_v17 = vld [vmem:[#allocation7 + $0x78] sm:$0xff]   ;;  %v783_v20 = vld [vmem:[#allocation5] ss:$8 sps:$4 sm:$0xff]   ;;  %v811_v21 = vld [vmem:[#allocation7 + $0x30] sm:$0xff]   ;;  %vm949_vm0 = vmmov 0   ;;  %s950_s26 = smov [#allocation10]  }
  0x3b   :  { %293 = vmatprep.subr.bf16.mxu0 %v766_v4  ;;  %v809_v18 = vld [vmem:[#allocation7 + $0x38] sm:$0xff]   ;;  %698 = vmatprep.subr.bf16.mxu1 %v808_v17  ;;  %v812_v22 = vld [vmem:[#allocation7 + $0x68] sm:$0xff]   ;;  %v814_v26 = vld [vmem:[#allocation7 + $0x60] sm:$0xff]   ;;  %v121_v55 = vsub.s32 0, %v120_v54  ;;  %v125_v57 = vsub.s32 1, %v120_v54  ;;  %s629_s27 = sshll.u32 %s950_s26, 4  ;;  %s630_s27 = int_to_ptr.vmem [resolvable:$true] %s629_s27 }
  0x3c   :  { %321 = vmatprep.mubr.bf16.mxu0 %v84_v16  ;;  %699 = vmatpush3.bf16.msra.mxu1 %v809_v18  ;;  %v784_v23 = vld [vmem:[#allocation5 + $0xf4] ss:$8 sps:$4 sm:$0xff]   ;;  %v786_v24 = vld [vmem:[#allocation5 + $0xf0] ss:$8 sps:$4 sm:$0xff]   ;;  %v813_v25 = vld [vmem:[#allocation7 + $0x28] sm:$0xff]   ;;  %p917_p7 = scmp.lt.s32.totalorder %s630_s27, %s630_s27 }
  0x3d   :  { %700 = vmatprep.subr.bf16.mxu1 %v810_v19  ;;  %v787_v27 = vld [vmem:[#allocation5 + $0xe4] ss:$8 sps:$4 sm:$0xff]   ;;  %v789_v28 = vld [vmem:[#allocation5 + $0xe0] ss:$8 sps:$4 sm:$0xff]   ;;  %v790_v30 = vld [vmem:[#allocation5 + $0xd4] ss:$8 sps:$4 sm:$0xff]  }
  0x3e   :  { %294 = vmatpush1.bf16.msra.mxu0 %v768_v5  ;;  %v815_v29 = vld [vmem:[#allocation7 + $0x20] sm:$0xff]   ;;  %v816_v31 = vld [vmem:[#allocation7 + $0x58] sm:$0xff]   ;;  %v818_v34 = vld [vmem:[#allocation7 + $0x50] sm:$0xff]  }
  0x3f   :  { %295 = vmatprep.subr.bf16.mxu0 %v769_v6  ;;  %v817_v32 = vld [vmem:[#allocation7 + $0x18] sm:$0xff]   ;;  %v793_v35 = vld [vmem:[#allocation5 + $0xc4] ss:$8 sps:$4 sm:$0xff]   ;;  %v819_v36 = vld [vmem:[#allocation7 + $0x10] sm:$0xff]  }
  0x40   :  { %701 = vmatpush3.bf16.msra.mxu1 %v811_v21  ;;  %v792_v33 = vld [vmem:[#allocation5 + $0xd0] ss:$8 sps:$4 sm:$0xff]   ;;  %v795_v37 = vld [vmem:[#allocation5 + $0xc0] ss:$8 sps:$4 sm:$0xff]   ;;  %v796_v38 = vld [vmem:[#allocation5 + $0xb4] ss:$8 sps:$4 sm:$0xff]  }
  0x41   :  { %702 = vmatprep.subr.bf16.mxu1 %v812_v22  ;;  %v798_v39 = vld [vmem:[#allocation5 + $0xb0] ss:$8 sps:$4 sm:$0xff]   ;;  %v799_v40 = vld [vmem:[#allocation5 + $0xa4] ss:$8 sps:$4 sm:$0xff]   ;;  %v801_v41 = vld [vmem:[#allocation5 + $0xa0] ss:$8 sps:$4 sm:$0xff]  }
  0x42   :  { %296 = vmatpush1.bf16.msra.mxu0 %v771_v7  ;;  %v802_v42 = vld [vmem:[#allocation5 + $0x94] ss:$8 sps:$4 sm:$0xff]   ;;  %v804_v43 = vld [vmem:[#allocation5 + $0x90] ss:$8 sps:$4 sm:$0xff]   ;;  %v805_v44 = vld [vmem:[#allocation5 + $0x84] ss:$8 sps:$4 sm:$0xff]  }
  0x43   :  { %297 = vmatprep.subr.bf16.mxu0 %v772_v8  ;;  %v807_v45 = vld [vmem:[#allocation5 + $0x80] ss:$8 sps:$4 sm:$0xff]   ;;  %v81_v46 = vld [vmem:[#allocation2] sm:$0xff]  ;;  %v824_v5 = vld [vmem:[#allocation8 + $0x38] sm:$0xff]  }
  0x44   :  { %703 = vmatpush3.bf16.msra.mxu1 %v813_v25  ;;  %v83_v47 = vpack.c.bf16 %v81_v46, %v81_v46  ;;  %v820_v48 = vld [vmem:[#allocation7 + $0x48] sm:$0xff]   ;;  %v822_v50 = vld [vmem:[#allocation7 + $0x40] sm:$0xff]   ;;  %v117_v56 = vld [vmem:[%s1017_s2] sm:$0x3] }
  0x45   :  { %704 = vmatprep.subr.bf16.mxu1 %v814_v26  ;;  %v821_v49 = vld [vmem:[#allocation7 + $0x8] sm:$0xff]   ;;  %v823_v51 = vld [vmem:[#allocation7] sm:$0xff]   ;;  %v122_v58 = vrot.slane %v117_v56, %v121_v55  ;;  %v126_v59 = vrot.slane %v117_v56, %v125_v57  ;;  %v825_v7 = vld [vmem:[#allocation8 + $0x30] sm:$0xff]  }
  0x46   :  { %298 = vmatpush1.bf16.msra.mxu0 %v774_v9  ;;  %v826_v8 = vld [vmem:[#allocation8 + $0x28] sm:$0xff]   ;;  %v827_v9 = vld [vmem:[#allocation8 + $0x20] sm:$0xff]  }
  0x47   :  { %299 = vmatprep.subr.bf16.mxu0 %v775_v10  ;;  %v828_v10 = vld [vmem:[#allocation8 + $0x18] sm:$0xff]  }
  0x48   :  { %705 = vmatpush3.bf16.msra.mxu1 %v815_v29 }
  0x49   :  { %706 = vmatprep.subr.bf16.mxu1 %v816_v31 }
  0x4a   :  { %300 = vmatpush1.bf16.msra.mxu0 %v777_v11  ;;  %v829_v11 = vld [vmem:[#allocation8 + $0x10] sm:$0xff]  }
  0x4b   :  { %301 = vmatprep.subr.bf16.mxu0 %v778_v12  ;;  %v830_v12 = vld [vmem:[#allocation8 + $0x8] sm:$0xff]  }
  0x4c   :  { %707 = vmatpush3.bf16.msra.mxu1 %v817_v32 }
  0x4d   :  { %708 = vmatprep.subr.bf16.mxu1 %v818_v34 }
  0x4e   :  { %302 = vmatpush1.bf16.msra.mxu0 %v780_v13  ;;  %v831_v13 = vld [vmem:[#allocation8] sm:$0xff]  }
  0x4f   :  { %303 = vmatprep.subr.bf16.mxu0 %v781_v15  ;;  %v672_v15 = vld [vmem:[%s1019_s4] ss:$0 sm:$0xff]  ;;  %s912_s4 = scalar_lea.vmem %s630_s27, 128 }
  0x50   :  { %709 = vmatpush3.bf16.msra.mxu1 %v819_v36  ;;  %p913_p6 = scmp.ne.s32.totalorder %s630_s27, %s912_s4  ;;  %p918_p8 = scmp.lt.s32.totalorder %s912_s4, %s912_s4 }
  0x51   :  { %710 = vmatprep.subr.bf16.mxu1 %v820_v48 }
  0x52   :  { %304 = vmatpush1.bf16.msra.mxu0 %v783_v20  ;;  %p919_p9 = por %p918_p8, %p917_p7 }
  0x53   :  { %305 = vmatprep.subr.bf16.mxu0 %v784_v23  ;;  %v689_v23 = vld [vmem:[%s1021_s6] ss:$0 sm:$0xff] }
  0x54   :  { %711 = vmatpush3.bf16.msra.mxu1 %v821_v49  ;;  %p920_p10 = pnand %p919_p9, %p913_p6 }
  0x55   :  { %712 = vmatprep.subr.bf16.mxu1 %v822_v50 }
  0x56   :  { %306 = vmatpush2.bf16.msra.mxu0 %v786_v24 }
  0x57   :  { %307 = vmatprep.subr.bf16.mxu0 %v787_v27 }
  0x58   :  { %713 = vmatpush3.bf16.msra.mxu1 %v823_v51 }
  0x59   :  { %729 = vmatprep.subr.bf16.mxu1 %v948_v52 }
  0x5a   :  { %308 = vmatpush2.bf16.msra.mxu0 %v789_v28 }
  0x5b   :  { %309 = vmatprep.subr.bf16.mxu0 %v790_v30 }
  0x5e   :  { %310 = vmatpush2.bf16.msra.mxu0 %v792_v33 }
  0x5f   :  { %311 = vmatprep.subr.bf16.mxu0 %v793_v35 }
  0x62   :  { %312 = vmatpush2.bf16.msra.mxu0 %v795_v37 }
  0x63   :  { %313 = vmatprep.subr.bf16.mxu0 %v796_v38 }
  0x66   :  { %314 = vmatpush2.bf16.msra.mxu0 %v798_v39 }
  0x67   :  { %315 = vmatprep.subr.bf16.mxu0 %v799_v40 }
  0x6a   :  { %316 = vmatpush2.bf16.msra.mxu0 %v801_v41 }
  0x6b   :  { %317 = vmatprep.subr.bf16.mxu0 %v802_v42 }
  0x6e   :  { %318 = vmatpush2.bf16.msra.mxu0 %v804_v43 }
  0x6f   :  { %319 = vmatprep.subr.bf16.mxu0 %v805_v44 }
  0x72   :  { %320 = vmatpush2.bf16.msra.mxu0 %v807_v45 }
  0x75   :  { %322 = vmatmul.mubr.bf16.vlgmr.msra.gmra.mxu0 %v83_v47 }
 0x135   :  { %v323_v60 = vpop.f32.mrf.mxu0 }
 0x136   :  { %v324_v61 = vadd.f32 %v323_v60, %v122_v58 }
 0x137   :  { %v325_v62 = vpop.f32.mrf.mxu0 }
 0x138   :  { %v326_v63 = vadd.f32 %v325_v62, %v126_v59  ;;  %v330_v0 = vmax.f32 %v324_v61, 0.0 }
 0x139   :  { %v327_v1 = vpop.f32.mrf.mxu0 }
 0x13a   :  { %v331_v2 = vmax.f32 %v326_v63, 0.0  ;;  %v332_v6 = vpack.c.bf16 %v330_v0, %v330_v0 }
 0x13b   :  { %v328_v3 = vpop.f32.mrf.mxu0 }
 0x13c   :  { %v333_v4 = vpack.c.bf16 %v331_v2, %v331_v2 }
 0x13e   :  { %501 = vmatprep.mubr.bf16.mxu1 %v333_v4 }
 0x13f   :  { %502 = vmatmul.mubr.bf16.vlgmr.msra.gmra.mxu1 %v332_v6 }
 0x140   :  { %730 = vmatpush3.bf16.msra.mxu1 %v824_v5  ;;  %745 = vmatprep.mubr.msk.bf16.mxu1 %vm949_vm0, %v948_v52 }
 0x141   :  { %731 = vmatprep.subr.bf16.mxu1 %v948_v52 }
 0x144   :  { %732 = vmatpush3.bf16.msra.mxu1 %v825_v7 }
 0x145   :  { %733 = vmatprep.subr.bf16.mxu1 %v948_v52 }
 0x148   :  { %734 = vmatpush3.bf16.msra.mxu1 %v826_v8 }
 0x149   :  { %735 = vmatprep.subr.bf16.mxu1 %v948_v52 }
 0x14c   :  { %736 = vmatpush3.bf16.msra.mxu1 %v827_v9 }
 0x14d   :  { %737 = vmatprep.subr.bf16.mxu1 %v948_v52 }
 0x150   :  { %738 = vmatpush3.bf16.msra.mxu1 %v828_v10 }
 0x151   :  { %739 = vmatprep.subr.bf16.mxu1 %v948_v52 }
 0x154   :  { %740 = vmatpush3.bf16.msra.mxu1 %v829_v11 }
 0x155   :  { %741 = vmatprep.subr.bf16.mxu1 %v948_v52 }
 0x158   :  { %742 = vmatpush3.bf16.msra.mxu1 %v830_v12 }
 0x159   :  { %743 = vmatprep.subr.bf16.mxu1 %v948_v52 }
 0x15c   :  { %744 = vmatpush3.bf16.msra.mxu1 %v831_v13 }
 0x1ff   :  { %v714_v14 = vpop.f32.mrf.mxu1 }
 0x201   :  { %v715_v16 = vpop.f32.mrf.mxu1 }
 0x202   :  { %v716_v17 = vadd.f32 %v715_v16, %v714_v14 }
 0x203   :  { %v717_v18 = vpop.f32.mrf.mxu1 }
 0x204   :  { %v504_v19 = vadd.f32 %v716_v17, %v672_v15 }
 0x205   :  { %v718_v20 = vpop.f32.mrf.mxu1 }
 0x206   :  { %v509_v21 = vmax.f32 %v504_v19, 0.0 }
 0x208   :  { %v510_v22 = vpack.c.bf16 %v509_v21, %v509_v21 }
 0x20a   :  { %746 = vmatmul.mubr.bf16.vlgmr.msra.gmra.mxu1 %v510_v22 }
 0x2ca   :  { %v616_v24 = vpop.f32.mrf.mxu1 }
 0x2cb   :  { %v617_v25 = vadd.f32 %v689_v23, %v616_v24 }
 0x2cc   :  { %v747_v26 = vpop.f32.mrf.mxu1 }
 0x2cd   :  { %622 = vst [vmem:[#allocation10] sm:$0xff] %v617_v25 }
 0x2ce   :  { %v619_v27 = vpop.f32.mrf.mxu1 }
 0x2cf   :  { %923 = shalt.err (!%p920_p10)
}
 0x2d0   :  { %632 = dma.vmem_to_hbm [thread:$0]  %s630_s27, 128, %s1022_s7, [#allocation4]   ;;  %v748_v28 = vpop.f32.mrf.mxu1 }
 0x2d1   :  { %938 = dma.done.wait [#allocation4], 128  }
 0x2d2   :  { %939 = vsyncadd [#allocation4], 4294967168 }
 0x2d3   :  { %636 = vsyncpa [#allocation3], 1 }
 0x2d4   :  { %637 = vsyncpa [#allocation6], 1 }
 0x2d5   :  { %638 = vsyncpa [#allocation9], 1 }
 0x2d6   :  { %639 = vsyncpa [#allocation4], 1 }

</bundles_post_ra>
